<compile_context>
chip_gen: v7x
topology: tpu7x:2x2x1
jax: 0.10.0
libtpu: 0.0.40
codegen_flags: <defaults>
</compile_context>

<pallas_src>
import functools

import jax
import jax.numpy as jnp
from jax import lax
from jax.experimental import pallas as pl
from jax.experimental.pallas import tpu as pltpu


_BB = 8  # batch rows per grid step (f32 sublane multiple)


# --------------------------------------------------------------------------
# Pallas kernel: full forward pass for one 8-row batch block.
# --------------------------------------------------------------------------
def _critic_kernel(x_ref, wih_ref, whh_ref, b_ref, w1_ref, b1_ref, w2_ref,
                   b2_ref, q_ref, *, hidden, seq_len, bblock):
    """x_ref:(T*BB,D)  wih:(D,4H)  whh:(H,4H)  b:(1,4H)  w1:(H,F)  b1:(1,F)
       w2:(1,F)  b2:(1,) in SMEM  ->  q_ref:(BB,T)."""
    H, T, BB = hidden, seq_len, bblock

    # (1) Input projection for ALL timesteps in one MXU pass (off the serial
    #     chain -> kept f32), LSTM biases folded in.
    xg = (jnp.dot(x_ref[...], wih_ref[...], preferred_element_type=jnp.float32)
          + b_ref[...])                                            # (T*BB, 4H)

    # Recurrent weight cast once to bf16: single-pass MXU per serial step.
    whh_bf = whh_ref[...].astype(jnp.bfloat16)                     # (H, 4H)
    w1 = w1_ref[...]                                               # (H, F)
    b1 = b1_ref[...]                                               # (1, F)
    w2 = w2_ref[...]                                               # (1, F)
    b2 = b2_ref[0]

    # (2) Serial LSTM recurrence; h/c live in vregs, loop unrolled (T static).
    #     (Switch to lax.fori_loop(..., unroll=True) if T grows beyond ~32.)
    h = jnp.zeros((BB, H), jnp.float32)
    c = jnp.zeros((BB, H), jnp.float32)
    q_cols = []
    for t in range(T):
        gates = xg[t * BB:(t + 1) * BB, :] + jnp.dot(
            h.astype(jnp.bfloat16), whh_bf,
            preferred_element_type=jnp.float32)                    # (BB, 4H)
        # One sigmoid + one tanh over the full 128-lane gates vreg, then slice.
        sg = jax.nn.sigmoid(gates)
        tg = jnp.tanh(gates)
        i_g = sg[:, 0 * H:1 * H]        # PyTorch gate order: i, f, g, o
        f_g = sg[:, 1 * H:2 * H]
        g_g = tg[:, 2 * H:3 * H]
        o_g = sg[:, 3 * H:4 * H]
        c = f_g * c + i_g * g_g
        h = o_g * jnp.tanh(c)
        # (3) Per-step head: independent of step t+1's recurrence, so it fills
        #     the otherwise idle MXU/EUP slots.  fc2 has N=1 -> VPU multiply +
        #     lane reduction instead of an MXU push/pop.
        z = jnp.maximum(
            jnp.dot(h, w1, preferred_element_type=jnp.float32) + b1, 0.0)
        q_cols.append(jnp.sum(z * w2, axis=-1, keepdims=True) + b2)  # (BB, 1)

    # Lane-dense single store of the whole block.
    q_ref[...] = jnp.concatenate(q_cols, axis=1)                   # (BB, T)


# --------------------------------------------------------------------------
# Parameter construction (deterministic, mirrors nn.LSTM / nn.Linear shapes)
# --------------------------------------------------------------------------
def init_params(key, lstm_input_dim, lstm_hidden_size, fc_hidden_size):
    D, H, F = lstm_input_dim, lstm_hidden_size, fc_hidden_size
    ks = jax.random.split(key, 8)
    s_lstm = 1.0 / jnp.sqrt(H)
    s_fc1 = 1.0 / jnp.sqrt(H)
    s_fc2 = 1.0 / jnp.sqrt(F)
    u = lambda k, shape, s: jax.random.uniform(k, shape, jnp.float32, -s, s)
    return {
        "w_ih": u(ks[0], (4 * H, D), s_lstm),
        "w_hh": u(ks[1], (4 * H, H), s_lstm),
        "b_ih": u(ks[2], (4 * H,), s_lstm),
        "b_hh": u(ks[3], (4 * H,), s_lstm),
        "fc1_w": u(ks[4], (F, H), s_fc1),
        "fc1_b": u(ks[5], (F,), s_fc1),
        "fc2_w": u(ks[6], (1, F), s_fc2),
        "fc2_b": u(ks[7], (1,), s_fc2),
    }


# --------------------------------------------------------------------------
# Wrapper: glue (concat, pad, block-layout, weight pre-transpose) + pallas_call
# --------------------------------------------------------------------------
def critic_forward(obs_history, action_history, params):
    assert obs_history.ndim == 3 and action_history.ndim == 3
    assert obs_history.shape[:2] == action_history.shape[:2]

    x = jnp.concatenate([obs_history, action_history], axis=2)     # (B, T, D)
    B, Tlen, D = x.shape
    H = params["w_hh"].shape[1]
    F = params["fc1_w"].shape[0]

    BB = _BB
    n_blk = -(-B // BB)
    B_pad = n_blk * BB

    # (n_blk, T*BB, D): time-major within each batch block, batch block leading
    # so the grid streams x per block and v7x can shard blocks across cores.
    x_p = x.astype(jnp.float32)
    if B_pad != B:
        x_p = jnp.pad(x_p, ((0, B_pad - B), (0, 0), (0, 0)))
    x_blk = (x_p.reshape(n_blk, BB, Tlen, D)
                .transpose(0, 2, 1, 3)                             # (nblk,T,BB,D)
                .reshape(n_blk, Tlen * BB, D))

    wih_t = params["w_ih"].T                                       # (D, 4H)
    whh_t = params["w_hh"].T                                       # (H, 4H)
    b = (params["b_ih"] + params["b_hh"])[None, :]                 # (1, 4H)
    w1_t = params["fc1_w"].T                                       # (H, F)
    b1 = params["fc1_b"][None, :]                                  # (1, F)
    w2_row = params["fc2_w"]                                       # (1, F)
    b2 = params["fc2_b"]                                           # (1,)

    kernel = functools.partial(_critic_kernel, hidden=H, seq_len=Tlen, bblock=BB)

    q_bt = pl.pallas_call(
        kernel,
        out_shape=jax.ShapeDtypeStruct((B_pad, Tlen), jnp.float32),
        grid=(n_blk,),
        in_specs=[
            pl.BlockSpec((None, Tlen * BB, D), lambda i: (i, 0, 0)),   # x block
            pl.BlockSpec((D, 4 * H), lambda i: (0, 0)),                # w_ih^T
            pl.BlockSpec((H, 4 * H), lambda i: (0, 0)),                # w_hh^T
            pl.BlockSpec((1, 4 * H), lambda i: (0, 0)),                # lstm bias
            pl.BlockSpec((H, F), lambda i: (0, 0)),                    # fc1 w^T
            pl.BlockSpec((1, F), lambda i: (0, 0)),                    # fc1 bias
            pl.BlockSpec((1, F), lambda i: (0, 0)),                    # fc2 w row
            pl.BlockSpec(memory_space=pltpu.MemorySpace.SMEM),         # fc2 bias
        ],
        out_specs=pl.BlockSpec((BB, Tlen), lambda i: (i, 0)),
        compiler_params=pltpu.CompilerParams(
            dimension_semantics=("parallel",)),
    )(x_blk, wih_t, whh_t, b, w1_t, b1, w2_row, b2)

    # (B_pad, T) -> drop padded batch rows -> (B, T, 1)
    return q_bt[:B, :, None]


# --------------------------------------------------------------------------
# Pure-JAX reference (same math, f32 throughout) for a correctness check
# --------------------------------------------------------------------------
def critic_forward_ref(obs_history, action_history, params):
    x = jnp.concatenate([obs_history, action_history], axis=2).astype(jnp.float32)
    B, Tlen, D = x.shape
    H = params["w_hh"].shape[1]
    wih_t, whh_t = params["w_ih"].T, params["w_hh"].T
    b = params["b_ih"] + params["b_hh"]

    def step(carry, x_t):
        h, c = carry
        gates = x_t @ wih_t + h @ whh_t + b
        i = jax.nn.sigmoid(gates[:, 0 * H:1 * H])
        f = jax.nn.sigmoid(gates[:, 1 * H:2 * H])
        g = jnp.tanh(gates[:, 2 * H:3 * H])
        o = jax.nn.sigmoid(gates[:, 3 * H:4 * H])
        c = f * c + i * g
        h = o * jnp.tanh(c)
        return (h, c), h

    h0 = jnp.zeros((B, H), jnp.float32)
    (_, _), hs = lax.scan(step, (h0, h0), jnp.transpose(x, (1, 0, 2)))
    hs = jnp.transpose(hs, (1, 0, 2))                              # (B, T, H)
    z = jnp.maximum(hs @ params["fc1_w"].T + params["fc1_b"], 0.0)
    return z @ params["fc2_w"].T + params["fc2_b"]                 # (B, T, 1)


if __name__ == "__main__":
    # Small shapes implied by the module: (batch, T, obs_dim) / (batch, T, action_dim)
    batch, seq, obs_dim, act_dim = 4, 8, 12, 4
    lstm_input_dim = obs_dim + act_dim          # 16
    lstm_hidden_size = 32
    fc_hidden_size = 32

    key = jax.random.PRNGKey(0)
    k_obs, k_act, k_par = jax.random.split(key, 3)
    obs_history = jax.random.normal(k_obs, (batch, seq, obs_dim), jnp.float32)
    action_history = jax.random.normal(k_act, (batch, seq, act_dim), jnp.float32)
    params = init_params(k_par, lstm_input_dim, lstm_hidden_size, fc_hidden_size)

    q = critic_forward(obs_history, action_history, params)
    q = jax.block_until_ready(q)

    q_ref = jax.block_until_ready(critic_forward_ref(obs_history, action_history, params))
    assert q.shape == (batch, seq, 1)
    # Tolerance loosened vs v1: the recurrent h @ W_hh now uses bf16 operands
    # (f32 accumulation), which the f32 reference does not.
    assert jnp.allclose(q, q_ref, atol=2e-2, rtol=2e-2), "mismatch vs reference"

    print("KERNEL_OK")
</pallas_src>

<mosaic_0001>
module attributes {stable_mosaic.version = 11 : i64} {
  func.func @_critic_kernel(%arg0: i32, %arg1: memref<1x64x16xf32, #tpu.memory_space<vmem>>, %arg2: memref<16x128xf32, #tpu.memory_space<vmem>>, %arg3: memref<32x128xf32, #tpu.memory_space<vmem>>, %arg4: memref<1x128xf32, #tpu.memory_space<vmem>>, %arg5: memref<32x32xf32, #tpu.memory_space<vmem>>, %arg6: memref<1x32xf32, #tpu.memory_space<vmem>>, %arg7: memref<1x32xf32, #tpu.memory_space<vmem>>, %arg8: memref<1xf32, #tpu.memory_space<smem>>, %arg9: memref<8x8xf32, #tpu.memory_space<vmem>>) attributes {dimension_semantics = [#tpu.dimension_semantics<parallel>], iteration_bounds = array<i64: 1>, scalar_prefetch = 0 : i64, scratch_operands = 0 : i64, tpu.core_type = #tpu.core_type<tc>, window_params = [{transform_indices = @transform_0, window_bounds = array<i64: 1, 64, 16>}, {pipeline_mode = #tpu.pipeline_mode<synchronous>, transform_indices = @transform_1, window_bounds = array<i64: 16, 128>}, {pipeline_mode = #tpu.pipeline_mode<synchronous>, transform_indices = @transform_2, window_bounds = array<i64: 32, 128>}, {pipeline_mode = #tpu.pipeline_mode<synchronous>, transform_indices = @transform_3, window_bounds = array<i64: 1, 128>}, {pipeline_mode = #tpu.pipeline_mode<synchronous>, transform_indices = @transform_4, window_bounds = array<i64: 32, 32>}, {pipeline_mode = #tpu.pipeline_mode<synchronous>, transform_indices = @transform_5, window_bounds = array<i64: 1, 32>}, {pipeline_mode = #tpu.pipeline_mode<synchronous>, transform_indices = @transform_6, window_bounds = array<i64: 1, 32>}, {transform_indices = @transform_7, window_bounds = array<i64: 1>}, {transform_indices = @transform_8, window_bounds = array<i64: 8, 8>}]} {
    %c0 = arith.constant 0 : index
    %c0_0 = arith.constant 0 : index
    %c0_1 = arith.constant 0 : index
    %0 = vector.load %arg1[%c0, %c0_0, %c0_1] : memref<1x64x16xf32, #tpu.memory_space<vmem>>, vector<1x64x16xf32>
    %1 = vector.shape_cast %0 : vector<1x64x16xf32> to vector<64x16xf32>
    %c0_2 = arith.constant 0 : index
    %c0_3 = arith.constant 0 : index
    %2 = vector.load %arg2[%c0_2, %c0_3] : memref<16x128xf32, #tpu.memory_space<vmem>>, vector<16x128xf32>
    %cst = arith.constant dense<0.000000e+00> : vector<64x128xf32>
    %3 = tpu.matmul %1, %2, %cst {dimension_numbers = #tpu.dot_dimension_numbers<[1], [0], [0], [1], [0, 0, 1, 1], [], []>} : vector<64x16xf32>, vector<16x128xf32>, vector<64x128xf32> -> vector<64x128xf32>
    %c0_4 = arith.constant 0 : index
    %c0_5 = arith.constant 0 : index
    %4 = vector.load %arg4[%c0_4, %c0_5] : memref<1x128xf32, #tpu.memory_space<vmem>>, vector<1x128xf32>
    %5 = vector.broadcast %4 : vector<1x128xf32> to vector<64x128xf32>
    %6 = arith.addf %3, %5 : vector<64x128xf32>
    %c0_6 = arith.constant 0 : index
    %c0_7 = arith.constant 0 : index
    %7 = vector.load %arg3[%c0_6, %c0_7] : memref<32x128xf32, #tpu.memory_space<vmem>>, vector<32x128xf32>
    %8 = arith.truncf %7 : vector<32x128xf32> to vector<32x128xbf16>
    %c0_8 = arith.constant 0 : index
    %c0_9 = arith.constant 0 : index
    %9 = vector.load %arg5[%c0_8, %c0_9] : memref<32x32xf32, #tpu.memory_space<vmem>>, vector<32x32xf32>
    %c0_10 = arith.constant 0 : index
    %c0_11 = arith.constant 0 : index
    %10 = vector.load %arg6[%c0_10, %c0_11] : memref<1x32xf32, #tpu.memory_space<vmem>>, vector<1x32xf32>
    %c0_12 = arith.constant 0 : index
    %c0_13 = arith.constant 0 : index
    %11 = vector.load %arg7[%c0_12, %c0_13] : memref<1x32xf32, #tpu.memory_space<vmem>>, vector<1x32xf32>
    %c0_14 = arith.constant 0 : index
    %12 = memref.load %arg8[%c0_14] : memref<1xf32, #tpu.memory_space<smem>>
    %cst_15 = arith.constant 0.000000e+00 : f32
    %13 = vector.broadcast %cst_15 : f32 to vector<8x32xf32>
    %cst_16 = arith.constant 0.000000e+00 : f32
    %14 = vector.broadcast %cst_16 : f32 to vector<8x32xf32>
    %15 = vector.extract_strided_slice %6 {offsets = [0, 0], sizes = [8, 128], strides = [1, 1]} : vector<64x128xf32> to vector<8x128xf32>
    %16 = arith.truncf %13 : vector<8x32xf32> to vector<8x32xbf16>
    %cst_17 = arith.constant dense<0.000000e+00> : vector<8x128xf32>
    %17 = tpu.matmul %16, %8, %cst_17 {dimension_numbers = #tpu.dot_dimension_numbers<[1], [0], [0], [1], [0, 0, 1, 1], [], []>} : vector<8x32xbf16>, vector<32x128xbf16>, vector<8x128xf32> -> vector<8x128xf32>
    %18 = arith.addf %15, %17 : vector<8x128xf32>
    %19 = arith.negf %18 : vector<8x128xf32>
    %20 = math.exp %19 : vector<8x128xf32>
    %cst_18 = arith.constant 1.000000e+00 : f32
    %21 = vector.broadcast %cst_18 : f32 to vector<8x128xf32>
    %22 = arith.addf %21, %20 : vector<8x128xf32>
    %23 = arith.divf %21, %22 : vector<8x128xf32>
    %24 = math.tanh %18 : vector<8x128xf32>
    %25 = vector.extract_strided_slice %23 {offsets = [0, 0], sizes = [8, 32], strides = [1, 1]} : vector<8x128xf32> to vector<8x32xf32>
    %26 = vector.extract_strided_slice %23 {offsets = [0, 32], sizes = [8, 32], strides = [1, 1]} : vector<8x128xf32> to vector<8x32xf32>
    %27 = vector.extract_strided_slice %24 {offsets = [0, 64], sizes = [8, 32], strides = [1, 1]} : vector<8x128xf32> to vector<8x32xf32>
    %28 = vector.extract_strided_slice %23 {offsets = [0, 96], sizes = [8, 32], strides = [1, 1]} : vector<8x128xf32> to vector<8x32xf32>
    %29 = arith.mulf %26, %14 : vector<8x32xf32>
    %30 = arith.mulf %25, %27 : vector<8x32xf32>
    %31 = arith.addf %29, %30 : vector<8x32xf32>
    %32 = math.tanh %31 : vector<8x32xf32>
    %33 = arith.mulf %28, %32 : vector<8x32xf32>
    %cst_19 = arith.constant dense<0.000000e+00> : vector<8x32xf32>
    %34 = tpu.matmul %33, %9, %cst_19 {dimension_numbers = #tpu.dot_dimension_numbers<[1], [0], [0], [1], [0, 0, 1, 1], [], []>} : vector<8x32xf32>, vector<32x32xf32>, vector<8x32xf32> -> vector<8x32xf32>
    %35 = vector.broadcast %10 : vector<1x32xf32> to vector<8x32xf32>
    %36 = arith.addf %34, %35 : vector<8x32xf32>
    %cst_20 = arith.constant 0.000000e+00 : f32
    %37 = vector.broadcast %cst_20 : f32 to vector<8x32xf32>
    %38 = arith.maximumf %36, %37 : vector<8x32xf32>
    %39 = vector.broadcast %11 : vector<1x32xf32> to vector<8x32xf32>
    %40 = arith.mulf %38, %39 : vector<8x32xf32>
    %cst_21 = arith.constant dense<0.000000e+00> : vector<8xf32>
    %41 = vector.multi_reduction <add>, %40, %cst_21 [1] : vector<8x32xf32> to vector<8xf32>
    %42 = vector.shape_cast %41 : vector<8xf32> to vector<8x1xf32>
    %43 = vector.broadcast %12 : f32 to vector<8x1xf32>
    %44 = arith.addf %42, %43 : vector<8x1xf32>
    %45 = vector.extract_strided_slice %6 {offsets = [8, 0], sizes = [8, 128], strides = [1, 1]} : vector<64x128xf32> to vector<8x128xf32>
    %46 = arith.truncf %33 : vector<8x32xf32> to vector<8x32xbf16>
    %cst_22 = arith.constant dense<0.000000e+00> : vector<8x128xf32>
    %47 = tpu.matmul %46, %8, %cst_22 {dimension_numbers = #tpu.dot_dimension_numbers<[1], [0], [0], [1], [0, 0, 1, 1], [], []>} : vector<8x32xbf16>, vector<32x128xbf16>, vector<8x128xf32> -> vector<8x128xf32>
    %48 = arith.addf %45, %47 : vector<8x128xf32>
    %49 = arith.negf %48 : vector<8x128xf32>
    %50 = math.exp %49 : vector<8x128xf32>
    %cst_23 = arith.constant 1.000000e+00 : f32
    %51 = vector.broadcast %cst_23 : f32 to vector<8x128xf32>
    %52 = arith.addf %51, %50 : vector<8x128xf32>
    %53 = arith.divf %51, %52 : vector<8x128xf32>
    %54 = math.tanh %48 : vector<8x128xf32>
    %55 = vector.extract_strided_slice %53 {offsets = [0, 0], sizes = [8, 32], strides = [1, 1]} : vector<8x128xf32> to vector<8x32xf32>
    %56 = vector.extract_strided_slice %53 {offsets = [0, 32], sizes = [8, 32], strides = [1, 1]} : vector<8x128xf32> to vector<8x32xf32>
    %57 = vector.extract_strided_slice %54 {offsets = [0, 64], sizes = [8, 32], strides = [1, 1]} : vector<8x128xf32> to vector<8x32xf32>
    %58 = vector.extract_strided_slice %53 {offsets = [0, 96], sizes = [8, 32], strides = [1, 1]} : vector<8x128xf32> to vector<8x32xf32>
    %59 = arith.mulf %56, %31 : vector<8x32xf32>
    %60 = arith.mulf %55, %57 : vector<8x32xf32>
    %61 = arith.addf %59, %60 : vector<8x32xf32>
    %62 = math.tanh %61 : vector<8x32xf32>
    %63 = arith.mulf %58, %62 : vector<8x32xf32>
    %cst_24 = arith.constant dense<0.000000e+00> : vector<8x32xf32>
    %64 = tpu.matmul %63, %9, %cst_24 {dimension_numbers = #tpu.dot_dimension_numbers<[1], [0], [0], [1], [0, 0, 1, 1], [], []>} : vector<8x32xf32>, vector<32x32xf32>, vector<8x32xf32> -> vector<8x32xf32>
    %65 = vector.broadcast %10 : vector<1x32xf32> to vector<8x32xf32>
    %66 = arith.addf %64, %65 : vector<8x32xf32>
    %cst_25 = arith.constant 0.000000e+00 : f32
    %67 = vector.broadcast %cst_25 : f32 to vector<8x32xf32>
    %68 = arith.maximumf %66, %67 : vector<8x32xf32>
    %69 = vector.broadcast %11 : vector<1x32xf32> to vector<8x32xf32>
    %70 = arith.mulf %68, %69 : vector<8x32xf32>
    %cst_26 = arith.constant dense<0.000000e+00> : vector<8xf32>
    %71 = vector.multi_reduction <add>, %70, %cst_26 [1] : vector<8x32xf32> to vector<8xf32>
    %72 = vector.shape_cast %71 : vector<8xf32> to vector<8x1xf32>
    %73 = vector.broadcast %12 : f32 to vector<8x1xf32>
    %74 = arith.addf %72, %73 : vector<8x1xf32>
    %75 = vector.extract_strided_slice %6 {offsets = [16, 0], sizes = [8, 128], strides = [1, 1]} : vector<64x128xf32> to vector<8x128xf32>
    %76 = arith.truncf %63 : vector<8x32xf32> to vector<8x32xbf16>
    %cst_27 = arith.constant dense<0.000000e+00> : vector<8x128xf32>
    %77 = tpu.matmul %76, %8, %cst_27 {dimension_numbers = #tpu.dot_dimension_numbers<[1], [0], [0], [1], [0, 0, 1, 1], [], []>} : vector<8x32xbf16>, vector<32x128xbf16>, vector<8x128xf32> -> vector<8x128xf32>
    %78 = arith.addf %75, %77 : vector<8x128xf32>
    %79 = arith.negf %78 : vector<8x128xf32>
    %80 = math.exp %79 : vector<8x128xf32>
    %cst_28 = arith.constant 1.000000e+00 : f32
    %81 = vector.broadcast %cst_28 : f32 to vector<8x128xf32>
    %82 = arith.addf %81, %80 : vector<8x128xf32>
    %83 = arith.divf %81, %82 : vector<8x128xf32>
    %84 = math.tanh %78 : vector<8x128xf32>
    %85 = vector.extract_strided_slice %83 {offsets = [0, 0], sizes = [8, 32], strides = [1, 1]} : vector<8x128xf32> to vector<8x32xf32>
    %86 = vector.extract_strided_slice %83 {offsets = [0, 32], sizes = [8, 32], strides = [1, 1]} : vector<8x128xf32> to vector<8x32xf32>
    %87 = vector.extract_strided_slice %84 {offsets = [0, 64], sizes = [8, 32], strides = [1, 1]} : vector<8x128xf32> to vector<8x32xf32>
    %88 = vector.extract_strided_slice %83 {offsets = [0, 96], sizes = [8, 32], strides = [1, 1]} : vector<8x128xf32> to vector<8x32xf32>
    %89 = arith.mulf %86, %61 : vector<8x32xf32>
    %90 = arith.mulf %85, %87 : vector<8x32xf32>
    %91 = arith.addf %89, %90 : vector<8x32xf32>
    %92 = math.tanh %91 : vector<8x32xf32>
    %93 = arith.mulf %88, %92 : vector<8x32xf32>
    %cst_29 = arith.constant dense<0.000000e+00> : vector<8x32xf32>
    %94 = tpu.matmul %93, %9, %cst_29 {dimension_numbers = #tpu.dot_dimension_numbers<[1], [0], [0], [1], [0, 0, 1, 1], [], []>} : vector<8x32xf32>, vector<32x32xf32>, vector<8x32xf32> -> vector<8x32xf32>
    %95 = vector.broadcast %10 : vector<1x32xf32> to vector<8x32xf32>
    %96 = arith.addf %94, %95 : vector<8x32xf32>
    %cst_30 = arith.constant 0.000000e+00 : f32
    %97 = vector.broadcast %cst_30 : f32 to vector<8x32xf32>
    %98 = arith.maximumf %96, %97 : vector<8x32xf32>
    %99 = vector.broadcast %11 : vector<1x32xf32> to vector<8x32xf32>
    %100 = arith.mulf %98, %99 : vector<8x32xf32>
    %cst_31 = arith.constant dense<0.000000e+00> : vector<8xf32>
    %101 = vector.multi_reduction <add>, %100, %cst_31 [1] : vector<8x32xf32> to vector<8xf32>
    %102 = vector.shape_cast %101 : vector<8xf32> to vector<8x1xf32>
    %103 = vector.broadcast %12 : f32 to vector<8x1xf32>
    %104 = arith.addf %102, %103 : vector<8x1xf32>
    %105 = vector.extract_strided_slice %6 {offsets = [24, 0], sizes = [8, 128], strides = [1, 1]} : vector<64x128xf32> to vector<8x128xf32>
    %106 = arith.truncf %93 : vector<8x32xf32> to vector<8x32xbf16>
    %cst_32 = arith.constant dense<0.000000e+00> : vector<8x128xf32>
    %107 = tpu.matmul %106, %8, %cst_32 {dimension_numbers = #tpu.dot_dimension_numbers<[1], [0], [0], [1], [0, 0, 1, 1], [], []>} : vector<8x32xbf16>, vector<32x128xbf16>, vector<8x128xf32> -> vector<8x128xf32>
    %108 = arith.addf %105, %107 : vector<8x128xf32>
    %109 = arith.negf %108 : vector<8x128xf32>
    %110 = math.exp %109 : vector<8x128xf32>
    %cst_33 = arith.constant 1.000000e+00 : f32
    %111 = vector.broadcast %cst_33 : f32 to vector<8x128xf32>
    %112 = arith.addf %111, %110 : vector<8x128xf32>
    %113 = arith.divf %111, %112 : vector<8x128xf32>
    %114 = math.tanh %108 : vector<8x128xf32>
    %115 = vector.extract_strided_slice %113 {offsets = [0, 0], sizes = [8, 32], strides = [1, 1]} : vector<8x128xf32> to vector<8x32xf32>
    %116 = vector.extract_strided_slice %113 {offsets = [0, 32], sizes = [8, 32], strides = [1, 1]} : vector<8x128xf32> to vector<8x32xf32>
    %117 = vector.extract_strided_slice %114 {offsets = [0, 64], sizes = [8, 32], strides = [1, 1]} : vector<8x128xf32> to vector<8x32xf32>
    %118 = vector.extract_strided_slice %113 {offsets = [0, 96], sizes = [8, 32], strides = [1, 1]} : vector<8x128xf32> to vector<8x32xf32>
    %119 = arith.mulf %116, %91 : vector<8x32xf32>
    %120 = arith.mulf %115, %117 : vector<8x32xf32>
    %121 = arith.addf %119, %120 : vector<8x32xf32>
    %122 = math.tanh %121 : vector<8x32xf32>
    %123 = arith.mulf %118, %122 : vector<8x32xf32>
    %cst_34 = arith.constant dense<0.000000e+00> : vector<8x32xf32>
    %124 = tpu.matmul %123, %9, %cst_34 {dimension_numbers = #tpu.dot_dimension_numbers<[1], [0], [0], [1], [0, 0, 1, 1], [], []>} : vector<8x32xf32>, vector<32x32xf32>, vector<8x32xf32> -> vector<8x32xf32>
    %125 = vector.broadcast %10 : vector<1x32xf32> to vector<8x32xf32>
    %126 = arith.addf %124, %125 : vector<8x32xf32>
    %cst_35 = arith.constant 0.000000e+00 : f32
    %127 = vector.broadcast %cst_35 : f32 to vector<8x32xf32>
    %128 = arith.maximumf %126, %127 : vector<8x32xf32>
    %129 = vector.broadcast %11 : vector<1x32xf32> to vector<8x32xf32>
    %130 = arith.mulf %128, %129 : vector<8x32xf32>
    %cst_36 = arith.constant dense<0.000000e+00> : vector<8xf32>
    %131 = vector.multi_reduction <add>, %130, %cst_36 [1] : vector<8x32xf32> to vector<8xf32>
    %132 = vector.shape_cast %131 : vector<8xf32> to vector<8x1xf32>
    %133 = vector.broadcast %12 : f32 to vector<8x1xf32>
    %134 = arith.addf %132, %133 : vector<8x1xf32>
    %135 = vector.extract_strided_slice %6 {offsets = [32, 0], sizes = [8, 128], strides = [1, 1]} : vector<64x128xf32> to vector<8x128xf32>
    %136 = arith.truncf %123 : vector<8x32xf32> to vector<8x32xbf16>
    %cst_37 = arith.constant dense<0.000000e+00> : vector<8x128xf32>
    %137 = tpu.matmul %136, %8, %cst_37 {dimension_numbers = #tpu.dot_dimension_numbers<[1], [0], [0], [1], [0, 0, 1, 1], [], []>} : vector<8x32xbf16>, vector<32x128xbf16>, vector<8x128xf32> -> vector<8x128xf32>
    %138 = arith.addf %135, %137 : vector<8x128xf32>
    %139 = arith.negf %138 : vector<8x128xf32>
    %140 = math.exp %139 : vector<8x128xf32>
    %cst_38 = arith.constant 1.000000e+00 : f32
    %141 = vector.broadcast %cst_38 : f32 to vector<8x128xf32>
    %142 = arith.addf %141, %140 : vector<8x128xf32>
    %143 = arith.divf %141, %142 : vector<8x128xf32>
    %144 = math.tanh %138 : vector<8x128xf32>
    %145 = vector.extract_strided_slice %143 {offsets = [0, 0], sizes = [8, 32], strides = [1, 1]} : vector<8x128xf32> to vector<8x32xf32>
    %146 = vector.extract_strided_slice %143 {offsets = [0, 32], sizes = [8, 32], strides = [1, 1]} : vector<8x128xf32> to vector<8x32xf32>
    %147 = vector.extract_strided_slice %144 {offsets = [0, 64], sizes = [8, 32], strides = [1, 1]} : vector<8x128xf32> to vector<8x32xf32>
    %148 = vector.extract_strided_slice %143 {offsets = [0, 96], sizes = [8, 32], strides = [1, 1]} : vector<8x128xf32> to vector<8x32xf32>
    %149 = arith.mulf %146, %121 : vector<8x32xf32>
    %150 = arith.mulf %145, %147 : vector<8x32xf32>
    %151 = arith.addf %149, %150 : vector<8x32xf32>
    %152 = math.tanh %151 : vector<8x32xf32>
    %153 = arith.mulf %148, %152 : vector<8x32xf32>
    %cst_39 = arith.constant dense<0.000000e+00> : vector<8x32xf32>
    %154 = tpu.matmul %153, %9, %cst_39 {dimension_numbers = #tpu.dot_dimension_numbers<[1], [0], [0], [1], [0, 0, 1, 1], [], []>} : vector<8x32xf32>, vector<32x32xf32>, vector<8x32xf32> -> vector<8x32xf32>
    %155 = vector.broadcast %10 : vector<1x32xf32> to vector<8x32xf32>
    %156 = arith.addf %154, %155 : vector<8x32xf32>
    %cst_40 = arith.constant 0.000000e+00 : f32
    %157 = vector.broadcast %cst_40 : f32 to vector<8x32xf32>
    %158 = arith.maximumf %156, %157 : vector<8x32xf32>
    %159 = vector.broadcast %11 : vector<1x32xf32> to vector<8x32xf32>
    %160 = arith.mulf %158, %159 : vector<8x32xf32>
    %cst_41 = arith.constant dense<0.000000e+00> : vector<8xf32>
    %161 = vector.multi_reduction <add>, %160, %cst_41 [1] : vector<8x32xf32> to vector<8xf32>
    %162 = vector.shape_cast %161 : vector<8xf32> to vector<8x1xf32>
    %163 = vector.broadcast %12 : f32 to vector<8x1xf32>
    %164 = arith.addf %162, %163 : vector<8x1xf32>
    %165 = vector.extract_strided_slice %6 {offsets = [40, 0], sizes = [8, 128], strides = [1, 1]} : vector<64x128xf32> to vector<8x128xf32>
    %166 = arith.truncf %153 : vector<8x32xf32> to vector<8x32xbf16>
    %cst_42 = arith.constant dense<0.000000e+00> : vector<8x128xf32>
    %167 = tpu.matmul %166, %8, %cst_42 {dimension_numbers = #tpu.dot_dimension_numbers<[1], [0], [0], [1], [0, 0, 1, 1], [], []>} : vector<8x32xbf16>, vector<32x128xbf16>, vector<8x128xf32> -> vector<8x128xf32>
    %168 = arith.addf %165, %167 : vector<8x128xf32>
    %169 = arith.negf %168 : vector<8x128xf32>
    %170 = math.exp %169 : vector<8x128xf32>
    %cst_43 = arith.constant 1.000000e+00 : f32
    %171 = vector.broadcast %cst_43 : f32 to vector<8x128xf32>
    %172 = arith.addf %171, %170 : vector<8x128xf32>
    %173 = arith.divf %171, %172 : vector<8x128xf32>
    %174 = math.tanh %168 : vector<8x128xf32>
    %175 = vector.extract_strided_slice %173 {offsets = [0, 0], sizes = [8, 32], strides = [1, 1]} : vector<8x128xf32> to vector<8x32xf32>
    %176 = vector.extract_strided_slice %173 {offsets = [0, 32], sizes = [8, 32], strides = [1, 1]} : vector<8x128xf32> to vector<8x32xf32>
    %177 = vector.extract_strided_slice %174 {offsets = [0, 64], sizes = [8, 32], strides = [1, 1]} : vector<8x128xf32> to vector<8x32xf32>
    %178 = vector.extract_strided_slice %173 {offsets = [0, 96], sizes = [8, 32], strides = [1, 1]} : vector<8x128xf32> to vector<8x32xf32>
    %179 = arith.mulf %176, %151 : vector<8x32xf32>
    %180 = arith.mulf %175, %177 : vector<8x32xf32>
    %181 = arith.addf %179, %180 : vector<8x32xf32>
    %182 = math.tanh %181 : vector<8x32xf32>
    %183 = arith.mulf %178, %182 : vector<8x32xf32>
    %cst_44 = arith.constant dense<0.000000e+00> : vector<8x32xf32>
    %184 = tpu.matmul %183, %9, %cst_44 {dimension_numbers = #tpu.dot_dimension_numbers<[1], [0], [0], [1], [0, 0, 1, 1], [], []>} : vector<8x32xf32>, vector<32x32xf32>, vector<8x32xf32> -> vector<8x32xf32>
    %185 = vector.broadcast %10 : vector<1x32xf32> to vector<8x32xf32>
    %186 = arith.addf %184, %185 : vector<8x32xf32>
    %cst_45 = arith.constant 0.000000e+00 : f32
    %187 = vector.broadcast %cst_45 : f32 to vector<8x32xf32>
    %188 = arith.maximumf %186, %187 : vector<8x32xf32>
    %189 = vector.broadcast %11 : vector<1x32xf32> to vector<8x32xf32>
    %190 = arith.mulf %188, %189 : vector<8x32xf32>
    %cst_46 = arith.constant dense<0.000000e+00> : vector<8xf32>
    %191 = vector.multi_reduction <add>, %190, %cst_46 [1] : vector<8x32xf32> to vector<8xf32>
    %192 = vector.shape_cast %191 : vector<8xf32> to vector<8x1xf32>
    %193 = vector.broadcast %12 : f32 to vector<8x1xf32>
    %194 = arith.addf %192, %193 : vector<8x1xf32>
    %195 = vector.extract_strided_slice %6 {offsets = [48, 0], sizes = [8, 128], strides = [1, 1]} : vector<64x128xf32> to vector<8x128xf32>
    %196 = arith.truncf %183 : vector<8x32xf32> to vector<8x32xbf16>
    %cst_47 = arith.constant dense<0.000000e+00> : vector<8x128xf32>
    %197 = tpu.matmul %196, %8, %cst_47 {dimension_numbers = #tpu.dot_dimension_numbers<[1], [0], [0], [1], [0, 0, 1, 1], [], []>} : vector<8x32xbf16>, vector<32x128xbf16>, vector<8x128xf32> -> vector<8x128xf32>
    %198 = arith.addf %195, %197 : vector<8x128xf32>
    %199 = arith.negf %198 : vector<8x128xf32>
    %200 = math.exp %199 : vector<8x128xf32>
    %cst_48 = arith.constant 1.000000e+00 : f32
    %201 = vector.broadcast %cst_48 : f32 to vector<8x128xf32>
    %202 = arith.addf %201, %200 : vector<8x128xf32>
    %203 = arith.divf %201, %202 : vector<8x128xf32>
    %204 = math.tanh %198 : vector<8x128xf32>
    %205 = vector.extract_strided_slice %203 {offsets = [0, 0], sizes = [8, 32], strides = [1, 1]} : vector<8x128xf32> to vector<8x32xf32>
    %206 = vector.extract_strided_slice %203 {offsets = [0, 32], sizes = [8, 32], strides = [1, 1]} : vector<8x128xf32> to vector<8x32xf32>
    %207 = vector.extract_strided_slice %204 {offsets = [0, 64], sizes = [8, 32], strides = [1, 1]} : vector<8x128xf32> to vector<8x32xf32>
    %208 = vector.extract_strided_slice %203 {offsets = [0, 96], sizes = [8, 32], strides = [1, 1]} : vector<8x128xf32> to vector<8x32xf32>
    %209 = arith.mulf %206, %181 : vector<8x32xf32>
    %210 = arith.mulf %205, %207 : vector<8x32xf32>
    %211 = arith.addf %209, %210 : vector<8x32xf32>
    %212 = math.tanh %211 : vector<8x32xf32>
    %213 = arith.mulf %208, %212 : vector<8x32xf32>
    %cst_49 = arith.constant dense<0.000000e+00> : vector<8x32xf32>
    %214 = tpu.matmul %213, %9, %cst_49 {dimension_numbers = #tpu.dot_dimension_numbers<[1], [0], [0], [1], [0, 0, 1, 1], [], []>} : vector<8x32xf32>, vector<32x32xf32>, vector<8x32xf32> -> vector<8x32xf32>
    %215 = vector.broadcast %10 : vector<1x32xf32> to vector<8x32xf32>
    %216 = arith.addf %214, %215 : vector<8x32xf32>
    %cst_50 = arith.constant 0.000000e+00 : f32
    %217 = vector.broadcast %cst_50 : f32 to vector<8x32xf32>
    %218 = arith.maximumf %216, %217 : vector<8x32xf32>
    %219 = vector.broadcast %11 : vector<1x32xf32> to vector<8x32xf32>
    %220 = arith.mulf %218, %219 : vector<8x32xf32>
    %cst_51 = arith.constant dense<0.000000e+00> : vector<8xf32>
    %221 = vector.multi_reduction <add>, %220, %cst_51 [1] : vector<8x32xf32> to vector<8xf32>
    %222 = vector.shape_cast %221 : vector<8xf32> to vector<8x1xf32>
    %223 = vector.broadcast %12 : f32 to vector<8x1xf32>
    %224 = arith.addf %222, %223 : vector<8x1xf32>
    %225 = vector.extract_strided_slice %6 {offsets = [56, 0], sizes = [8, 128], strides = [1, 1]} : vector<64x128xf32> to vector<8x128xf32>
    %226 = arith.truncf %213 : vector<8x32xf32> to vector<8x32xbf16>
    %cst_52 = arith.constant dense<0.000000e+00> : vector<8x128xf32>
    %227 = tpu.matmul %226, %8, %cst_52 {dimension_numbers = #tpu.dot_dimension_numbers<[1], [0], [0], [1], [0, 0, 1, 1], [], []>} : vector<8x32xbf16>, vector<32x128xbf16>, vector<8x128xf32> -> vector<8x128xf32>
    %228 = arith.addf %225, %227 : vector<8x128xf32>
    %229 = arith.negf %228 : vector<8x128xf32>
    %230 = math.exp %229 : vector<8x128xf32>
    %cst_53 = arith.constant 1.000000e+00 : f32
    %231 = vector.broadcast %cst_53 : f32 to vector<8x128xf32>
    %232 = arith.addf %231, %230 : vector<8x128xf32>
    %233 = arith.divf %231, %232 : vector<8x128xf32>
    %234 = math.tanh %228 : vector<8x128xf32>
    %235 = vector.extract_strided_slice %233 {offsets = [0, 0], sizes = [8, 32], strides = [1, 1]} : vector<8x128xf32> to vector<8x32xf32>
    %236 = vector.extract_strided_slice %233 {offsets = [0, 32], sizes = [8, 32], strides = [1, 1]} : vector<8x128xf32> to vector<8x32xf32>
    %237 = vector.extract_strided_slice %234 {offsets = [0, 64], sizes = [8, 32], strides = [1, 1]} : vector<8x128xf32> to vector<8x32xf32>
    %238 = vector.extract_strided_slice %233 {offsets = [0, 96], sizes = [8, 32], strides = [1, 1]} : vector<8x128xf32> to vector<8x32xf32>
    %239 = arith.mulf %236, %211 : vector<8x32xf32>
    %240 = arith.mulf %235, %237 : vector<8x32xf32>
    %241 = arith.addf %239, %240 : vector<8x32xf32>
    %242 = math.tanh %241 : vector<8x32xf32>
    %243 = arith.mulf %238, %242 : vector<8x32xf32>
    %cst_54 = arith.constant dense<0.000000e+00> : vector<8x32xf32>
    %244 = tpu.matmul %243, %9, %cst_54 {dimension_numbers = #tpu.dot_dimension_numbers<[1], [0], [0], [1], [0, 0, 1, 1], [], []>} : vector<8x32xf32>, vector<32x32xf32>, vector<8x32xf32> -> vector<8x32xf32>
    %245 = vector.broadcast %10 : vector<1x32xf32> to vector<8x32xf32>
    %246 = arith.addf %244, %245 : vector<8x32xf32>
    %cst_55 = arith.constant 0.000000e+00 : f32
    %247 = vector.broadcast %cst_55 : f32 to vector<8x32xf32>
    %248 = arith.maximumf %246, %247 : vector<8x32xf32>
    %249 = vector.broadcast %11 : vector<1x32xf32> to vector<8x32xf32>
    %250 = arith.mulf %248, %249 : vector<8x32xf32>
    %cst_56 = arith.constant dense<0.000000e+00> : vector<8xf32>
    %251 = vector.multi_reduction <add>, %250, %cst_56 [1] : vector<8x32xf32> to vector<8xf32>
    %252 = vector.shape_cast %251 : vector<8xf32> to vector<8x1xf32>
    %253 = vector.broadcast %12 : f32 to vector<8x1xf32>
    %254 = arith.addf %252, %253 : vector<8x1xf32>
    %255 = tpu.concatenate %44, %74, %104, %134, %164, %194, %224, %254 in 1 : vector<8x1xf32>, vector<8x1xf32>, vector<8x1xf32>, vector<8x1xf32>, vector<8x1xf32>, vector<8x1xf32>, vector<8x1xf32>, vector<8x1xf32> -> vector<8x8xf32>
    %c0_57 = arith.constant 0 : index
    %c0_58 = arith.constant 0 : index
    %256 = vector.load %arg9[%c0_57, %c0_58] : memref<8x8xf32, #tpu.memory_space<vmem>>, vector<8x8xf32>
    tpu.vector_store %arg9[%c0_57, %c0_58], %255 {strides = array<i32>} : memref<8x8xf32, #tpu.memory_space<vmem>>, vector<8x8xf32>,
    return
  }
  func.func @transform_0(%arg0: i32) -> (i32, i32, i32) {
    %c0_i32 = arith.constant 0 : i32
    %c0_i32_0 = arith.constant 0 : i32
    %c0_i32_1 = arith.constant 0 : i32
    return %arg0, %c0_i32, %c0_i32_0 : i32, i32, i32
  }
  func.func @transform_1(%arg0: i32) -> (i32, i32) {
    %c0_i32 = arith.constant 0 : i32
    %c0_i32_0 = arith.constant 0 : i32
    %c0_i32_1 = arith.constant 0 : i32
    return %c0_i32, %c0_i32_0 : i32, i32
  }
  func.func @transform_2(%arg0: i32) -> (i32, i32) {
    %c0_i32 = arith.constant 0 : i32
    %c0_i32_0 = arith.constant 0 : i32
    %c0_i32_1 = arith.constant 0 : i32
    return %c0_i32, %c0_i32_0 : i32, i32
  }
  func.func @transform_3(%arg0: i32) -> (i32, i32) {
    %c0_i32 = arith.constant 0 : i32
    %c0_i32_0 = arith.constant 0 : i32
    %c0_i32_1 = arith.constant 0 : i32
    return %c0_i32, %c0_i32_0 : i32, i32
  }
  func.func @transform_4(%arg0: i32) -> (i32, i32) {
    %c0_i32 = arith.constant 0 : i32
    %c0_i32_0 = arith.constant 0 : i32
    %c0_i32_1 = arith.constant 0 : i32
    return %c0_i32, %c0_i32_0 : i32, i32
  }
  func.func @transform_5(%arg0: i32) -> (i32, i32) {
    %c0_i32 = arith.constant 0 : i32
    %c0_i32_0 = arith.constant 0 : i32
    %c0_i32_1 = arith.constant 0 : i32
    return %c0_i32, %c0_i32_0 : i32, i32
  }
  func.func @transform_6(%arg0: i32) -> (i32, i32) {
    %c0_i32 = arith.constant 0 : i32
    %c0_i32_0 = arith.constant 0 : i32
    %c0_i32_1 = arith.constant 0 : i32
    return %c0_i32, %c0_i32_0 : i32, i32
  }
  func.func @transform_7(%arg0: i32) -> i32 {
    %c0_i32 = arith.constant 0 : i32
    %c0_i32_0 = arith.constant 0 : i32
    return %c0_i32 : i32
  }
  func.func @transform_8(%arg0: i32) -> (i32, i32) {
    %c0_i32 = arith.constant 0 : i32
    %c0_i32_0 = arith.constant 0 : i32
    return %arg0, %c0_i32 : i32, i32
  }
}

</mosaic_0001>

<bundles_post_ra>
// kernel: tpu_custom_call.1
= control target key start
LH: loop header
LB: loop body
LE: loop exit
PB: predicated region body
PF: predicated region fallthrough
CT: control target
= control target key end

     0   :  { %vm49_vm0 = vcmask 130048   ;;  %v1879_v3 = vmov 0.0   ;;  %vm1880_vm1 = vmmov 0   ;;  %s2238_s0 = inlined_call_operand.vmem [shape: f32[1,64,16], index: 0, kind: input, shape index: {}]   ;;  %s2239_s1 = inlined_call_operand.vmem [shape: f32[16,128], index: 1, kind: input, shape index: {}]   ;;  %s2240_s2 = inlined_call_operand.vmem [shape: f32[32,128], index: 2, kind: input, shape index: {}]   ;;  %s2241_s3 = inlined_call_operand.vmem [shape: f32[1,128], index: 3, kind: input, shape index: {}]   ;;  %s2242_s4 = inlined_call_operand.vmem [shape: f32[32,32], index: 4, kind: input, shape index: {}]   ;;  %s2243_s5 = inlined_call_operand.vmem [shape: f32[1,32], index: 5, kind: input, shape index: {}]   ;;  %s2244_s6 = inlined_call_operand.vmem [shape: f32[1,32], index: 6, kind: input, shape index: {}]   ;;  %s2245_s7 = inlined_call_operand.<no memory space> [shape: f32[1], index: 7, kind: input, shape index: {}]   ;;  %s2246_s8 = inlined_call_operand.hbm [shape: f32[8,8], index: 8, kind: output, shape index: {}]  }
   0x1   :  { %v40_v0 = vld [vmem:[%s2239_s1] sm:$0xff]  ;;  %v41_v1 = vld [vmem:[%s2239_s1 + $0x8] sm:$0xff]  ;;  %1580 = vmatprep.subr.bf16.mxu1 %v1879_v3  ;;  %1584 = vmatprep.mubr.msk.bf16.mxu1 %vm1880_vm1, %v1879_v3  ;;  %v181_v8 = vld [vmem:[%s2240_s2 + $0x10] sm:$0xff] }
   0x2   :  { %v179_v2 = vld [vmem:[%s2240_s2] sm:$0xff]  ;;  %v1732_v4 = vpack.c.bf16 %v41_v1, %v40_v0  ;;  %v180_v5 = vld [vmem:[%s2240_s2 + $0x8] sm:$0xff]  ;;  %v182_v9 = vld [vmem:[%s2240_s2 + $0x18] sm:$0xff] }
   0x3   :  { %v32_v6 = vld [vmem:[%s2238_s0] sm:$0xff]  ;;  %v1949_v7 = vpack.c.bf16 %v180_v5, %v179_v2 }
   0x4   :  { %1568 = vmatprep.mubr.msk.f32.mxu0 %vm49_vm0, %v32_v6 }
   0x5   :  { %14 = vsyncpa [#allocation4], 0  ;;  %1733 = vmatprep.subr.bf16.mxu0 %v1732_v4  ;;  %1581 = vmatpush3.bf16.msra.mxu1 %v1949_v7  ;;  %v33_v10 = vld [vmem:[%s2238_s0 + $0x8] sm:$0xff]  ;;  %v1962_v11 = vpack.c.bf16 %v182_v9, %v181_v8  ;;  %v1881_v12 = vmov 0   ;;  %v1977_v13 = vld [vmem:[%s2241_s3] ss:$0 sm:$0xff] }
   0x6   :  { %1735 = vmatpush3.bf16.msra.mxu0 %v1732_v4  ;;  %1582 = vmatprep.subr.bf16.mxu1 %v1879_v3  ;;  %s1882_s21 = smov 64   ;;  %s1883_s3 = smov 32   ;;  %v34_v32 = vld [vmem:[%s2238_s0 + $0x10] sm:$0xff]  ;;  %v35_v33 = vld [vmem:[%s2238_s0 + $0x18] sm:$0xff]  ;;  %v36_v34 = vld [vmem:[%s2238_s0 + $0x20] sm:$0xff]  ;;  %vm192_vm2 = vcmask 261120  }
   0x7   :  { %1599 = vmatprep.subr.bf16.mxu0 %v1879_v3  ;;  %v37_v35 = vld [vmem:[%s2238_s0 + $0x28] sm:$0xff]  ;;  %v38_v36 = vld [vmem:[%s2238_s0 + $0x30] sm:$0xff]  ;;  %v39_v37 = vld [vmem:[%s2238_s0 + $0x38] sm:$0xff]  ;;  %vm1426_vm3 = vcmask 7168   ;;  %vm1428_vm4 = vcmask 15360   ;;  %vm1430_vm5 = vcmask 23552  }
   0x8   :  { %vm1432_vm6 = vcmask 31744   ;;  %vm1434_vm7 = vcmask 39936   ;;  %vm1436_vm8 = vcmask 48128   ;;  %s1885_s20 = smov [#allocation3]   ;;  %vm1438_vm9 = vcmask 56320  }
   0x9   :  { %1569 = vmatmul.mubr.msk.f32.vlgmr.msra.gmra.mrb[0].mxu0 %vm49_vm0, %v33_v10  ;;  %1583 = vmatpush3.bf16.msra.mxu1 %v1962_v11  ;;  %vm1440_vm10 = vcmask 64512  }
   0xa   :  { %1600 = vmatpush3.bf16.msra.mxu0 %v1949_v7  ;;  %1571 = vmatprep.mubr.msk.f32.mxu0 %vm49_vm0, %v34_v32 }
   0xb   :  { %1601 = vmatprep.subr.bf16.mxu0 %v1879_v3 }
   0xc   :  { %1585 = vmatmul.mubr.bf16.vlgmr.msra.gmra.mrb[0].mxu1 %v1881_v12 }
   0xd   :  { %1596 = vmatprep.mubr.msk.f32.mxu1 %vm1880_vm1, %v1879_v3  ;;  %1572 = vmatmul.mubr.msk.f32.gmra.mrb[2].mxu0 %vm49_vm0, %v35_v33 }
   0xe   :  { %1602 = vmatpush3.bf16.msra.mxu0 %v1962_v11  ;;  %1574 = vmatprep.mubr.msk.f32.mxu0 %vm49_vm0, %v36_v34 }
   0xf   :  { %1618 = vmatprep.subr.bf16.mxu0 %v1879_v3 }
  0x11   :  { %1575 = vmatmul.mubr.msk.f32.gmra.mrb[4].mxu0 %vm49_vm0, %v37_v35 }
  0x12   :  { %1577 = vmatprep.mubr.msk.f32.mxu0 %vm49_vm0, %v38_v36 }
  0x15   :  { %1578 = vmatmul.mubr.msk.f32.gmra.mrb[6].mxu0 %vm49_vm0, %v39_v37 }
  0x16   :  { %1603 = vmatprep.mubr.msk.bf16.mxu0 %vm1880_vm1, %v1879_v3 }
  0xdc   :  { %v1570_v14 = vpop.f32.mrb[0].mxu0 }
  0xdd   :  { %v140_v15 = vpop.f32.mrb[1].mxu0  ;;  %v146_v49 = vadd.f32 %v1570_v14, %v1977_v13 }
  0xde   :  { %v141_v16 = vadd.f32 %v1977_v13, %v140_v15 }
  0xdf   :  { %v230_v17 = vpop.f32.mrb[0].mxu1 }
  0xe0   :  { %v236_v18 = vadd.f32 %v230_v17, %v141_v16  ;;  %v1586_v19 = vpop.f32.mrb[1].mxu1  ;;  %v2014_v42 = vpop.f32.mrb[2].mxu0 }
  0xe1   :  { %v233_v20 = vpop.f32.mrb[2].mxu1  ;;  %v150_v43 = vpop.f32.mrb[3].mxu0 }
  0xe2   :  { %1791 = vtanh.f32 %v236_v18  ;;  %v1587_v21 = vpop.f32.mrb[3].mxu1  ;;  %v1465_v23 = vmul.f32 -1.442695, %v236_v18  ;;  %v151_v8 = vadd.f32 %v1977_v13, %v150_v43 }
  0xe4   :  { %1793 = vpow2.f32 %v1465_v23  ;;  %v2016_v44 = vpop.f32.mrb[4].mxu0 }
  0xe5   :  { %v2018_v45 = vpop.f32.mrb[5].mxu0 }
  0xe8   :  { %v2020_v46 = vpop.f32.mrb[6].mxu0 }
  0xe9   :  { %v2022_v47 = vpop.f32.mrb[7].mxu0 }
  0xec   :  { %v1792_v22 = vpop.eup %1791 }
  0xed   :  { %246 = vrot.lane.b32.xlu0 %v1792_v22, %s1882_s21 }
  0xee   :  { %v1794_v24 = vpop.eup %1793 }
  0xef   :  { %v240_v25 = vadd.f32 1.0, %v1794_v24 }
  0xf1   :  { %1795 = vrcp.f32 %v240_v25 }
  0xfb   :  { %v1796_v26 = vpop.eup %1795 }
  0xfc   :  { %v244_v29 = vmul.f32 0.0, %v1796_v26 }
 0x15f   :  { %v247_v27 = vpop.permute.xlu0 %246 }
 0x160   :  { %v249_v28 = vmul.f32 %v1796_v26, %v247_v27 }
 0x162   :  { %251 = vrot.lane.b32.xlu0 %v249_v28, %s1883_s3 }
 0x1d4   :  { %v252_v30 = vpop.permute.xlu0 %251 }
 0x1d5   :  { %v254_v31 = vadd.f32 %v252_v30, %v244_v29 }
 0x1d7   :  { %1797 = vtanh.f32 %v254_v31 }
 0x1e1   :  { %v1798_v38 = vpop.eup %1797 }
 0x1e2   :  { %257 = vrot.lane.b32.xlu1 %v1798_v38, %s1882_s21 }
 0x254   :  { %v258_v39 = vpop.permute.xlu1 %257 }
 0x255   :  { %v2009_v40 = vmul.f32 %v1796_v26, %v258_v39 }
 0x257   :  { %v355_v41 = vpack.c.bf16 %v2009_v40, %v2009_v40 }
 0x259   :  { %357 = vrot.lane.b32.xlu1 %v355_v41, %s1883_s3 }
 0x2cb   :  { %v358_v48 = vpop.permute.xlu1 %357 }
 0x2cc   :  { %1604 = vmatmul.mubr.msk.bf16.vlgmr.msra.gmra.mrb[8].mxu0 %vm192_vm2, %v358_v48 }
 0x2cd   :  { %1619 = vmatpush3.bf16.msra.mxu0 %v1949_v7  ;;  %1622 = vmatprep.mubr.msk.bf16.mxu0 %vm1880_vm1, %v1879_v3 }
 0x2ce   :  { %1620 = vmatprep.subr.bf16.mxu0 %v1879_v3 }
 0x2d1   :  { %1621 = vmatpush3.bf16.msra.mxu0 %v1962_v11 }
 0x2d2   :  { %1637 = vmatprep.subr.bf16.mxu0 %v1879_v3 }
 0x39f   :  { %v396_v50 = vpop.f32.mrb[8].mxu0 }
 0x3a0   :  { %v402_v51 = vadd.f32 %v396_v50, %v146_v49  ;;  %v1605_v52 = vpop.f32.mrb[9].mxu0 }
 0x3a1   :  { %v399_v53 = vpop.f32.mrb[10].mxu0 }
 0x3a2   :  { %1799 = vtanh.f32 %v402_v51  ;;  %v1606_v54 = vpop.f32.mrb[11].mxu0  ;;  %v1470_v56 = vmul.f32 -1.442695, %v402_v51 }
 0x3a4   :  { %1801 = vpow2.f32 %v1470_v56 }
 0x3ac   :  { %v1800_v55 = vpop.eup %1799 }
 0x3ad   :  { %412 = vrot.lane.b32.xlu0 %v1800_v55, %s1882_s21 }
 0x3ae   :  { %v1802_v57 = vpop.eup %1801 }
 0x3af   :  { %v406_v58 = vadd.f32 1.0, %v1802_v57  ;;  %v161_v57 = vadd.f32 %v1977_v13, %v2018_v45 }
 0x3b1   :  { %1803 = vrcp.f32 %v406_v58 }
 0x3bb   :  { %v1804_v59 = vpop.eup %1803 }
 0x3bc   :  { %v410_v62 = vmul.f32 %v1804_v59, %v254_v31  ;;  %v156_v31 = vadd.f32 %v2014_v42, %v1977_v13 }
 0x41f   :  { %v413_v60 = vpop.permute.xlu0 %412 }
 0x420   :  { %v415_v61 = vmul.f32 %v1804_v59, %v413_v60 }
 0x422   :  { %417 = vrot.lane.b32.xlu1 %v415_v61, %s1883_s3 }
 0x494   :  { %v418_v63 = vpop.permute.xlu1 %417 }
 0x495   :  { %v420_v0 = vadd.f32 %v418_v63, %v410_v62 }
 0x497   :  { %1805 = vtanh.f32 %v420_v0 }
 0x4a1   :  { %v1806_v1 = vpop.eup %1805 }
 0x4a2   :  { %423 = vrot.lane.b32.xlu0 %v1806_v1, %s1882_s21 }
 0x514   :  { %v424_v2 = vpop.permute.xlu0 %423 }
 0x515   :  { %v2035_v4 = vmul.f32 %v1804_v59, %v424_v2 }
 0x517   :  { %v508_v5 = vpack.c.bf16 %v2035_v4, %v2035_v4 }
 0x519   :  { %510 = vrot.lane.b32.xlu1 %v508_v5, %s1883_s3 }
 0x58b   :  { %v511_v6 = vpop.permute.xlu1 %510 }
 0x58c   :  { %1623 = vmatmul.mubr.msk.bf16.vlgmr.msra.gmra.mrb[12].mxu0 %vm192_vm2, %v511_v6 }
 0x58d   :  { %1638 = vmatpush3.bf16.msra.mxu0 %v1949_v7  ;;  %1641 = vmatprep.mubr.msk.bf16.mxu0 %vm1880_vm1, %v1879_v3 }
 0x58e   :  { %1639 = vmatprep.subr.bf16.mxu0 %v1879_v3 }
 0x591   :  { %1640 = vmatpush3.bf16.msra.mxu0 %v1962_v11 }
 0x592   :  { %1656 = vmatprep.subr.bf16.mxu0 %v1879_v3 }
 0x65f   :  { %v549_v9 = vpop.f32.mrb[12].mxu0 }
 0x660   :  { %v555_v10 = vadd.f32 %v549_v9, %v151_v8  ;;  %v1624_v12 = vpop.f32.mrb[13].mxu0 }
 0x661   :  { %v552_v14 = vpop.f32.mrb[14].mxu0 }
 0x662   :  { %1807 = vtanh.f32 %v555_v10  ;;  %v1625_v15 = vpop.f32.mrb[15].mxu0  ;;  %v1473_v17 = vmul.f32 -1.442695, %v555_v10 }
 0x664   :  { %1809 = vpow2.f32 %v1473_v17 }
 0x66c   :  { %v1808_v16 = vpop.eup %1807 }
 0x66d   :  { %565 = vrot.lane.b32.xlu0 %v1808_v16, %s1882_s21 }
 0x66e   :  { %v1810_v18 = vpop.eup %1809 }
 0x66f   :  { %v559_v19 = vadd.f32 1.0, %v1810_v18  ;;  %v166_v18 = vadd.f32 %v2016_v44, %v1977_v13 }
 0x671   :  { %1811 = vrcp.f32 %v559_v19 }
 0x67b   :  { %v1812_v20 = vpop.eup %1811 }
 0x67c   :  { %v563_v23 = vmul.f32 %v1812_v20, %v420_v0 }
 0x6df   :  { %v566_v21 = vpop.permute.xlu0 %565 }
 0x6e0   :  { %v568_v22 = vmul.f32 %v1812_v20, %v566_v21 }
 0x6e2   :  { %570 = vrot.lane.b32.xlu1 %v568_v22, %s1883_s3 }
 0x754   :  { %v571_v24 = vpop.permute.xlu1 %570 }
 0x755   :  { %v573_v25 = vadd.f32 %v571_v24, %v563_v23 }
 0x757   :  { %1813 = vtanh.f32 %v573_v25 }
 0x761   :  { %v1814_v26 = vpop.eup %1813 }
 0x762   :  { %576 = vrot.lane.b32.xlu0 %v1814_v26, %s1882_s21 }
 0x7d4   :  { %v577_v27 = vpop.permute.xlu0 %576 }
 0x7d5   :  { %v2051_v28 = vmul.f32 %v1812_v20, %v577_v27 }
 0x7d7   :  { %v661_v29 = vpack.c.bf16 %v2051_v28, %v2051_v28 }
 0x7d9   :  { %663 = vrot.lane.b32.xlu1 %v661_v29, %s1883_s3 }
 0x84b   :  { %v664_v30 = vpop.permute.xlu1 %663 }
 0x84c   :  { %1642 = vmatmul.mubr.msk.bf16.vlgmr.msra.gmra.mrb[16].mxu0 %vm192_vm2, %v664_v30 }
 0x84d   :  { %1657 = vmatpush3.bf16.msra.mxu0 %v1949_v7  ;;  %1660 = vmatprep.mubr.msk.bf16.mxu0 %vm1880_vm1, %v1879_v3 }
 0x84e   :  { %1658 = vmatprep.subr.bf16.mxu0 %v1879_v3 }
 0x851   :  { %1659 = vmatpush3.bf16.msra.mxu0 %v1962_v11 }
 0x852   :  { %1675 = vmatprep.subr.bf16.mxu0 %v1879_v3 }
 0x91f   :  { %v702_v32 = vpop.f32.mrb[16].mxu0 }
 0x920   :  { %v708_v33 = vadd.f32 %v702_v32, %v156_v31  ;;  %v1643_v34 = vpop.f32.mrb[17].mxu0 }
 0x921   :  { %v705_v35 = vpop.f32.mrb[18].mxu0 }
 0x922   :  { %1815 = vtanh.f32 %v708_v33  ;;  %v1644_v36 = vpop.f32.mrb[19].mxu0  ;;  %v1476_v38 = vmul.f32 -1.442695, %v708_v33 }
 0x924   :  { %1817 = vpow2.f32 %v1476_v38 }
 0x92c   :  { %v1816_v37 = vpop.eup %1815 }
 0x92d   :  { %718 = vrot.lane.b32.xlu0 %v1816_v37, %s1882_s21 }
 0x92e   :  { %v1818_v39 = vpop.eup %1817 }
 0x92f   :  { %v712_v41 = vadd.f32 1.0, %v1818_v39  ;;  %v171_v39 = vadd.f32 %v1977_v13, %v2022_v47 }
 0x931   :  { %1819 = vrcp.f32 %v712_v41 }
 0x93b   :  { %v1820_v43 = vpop.eup %1819 }
 0x93c   :  { %v716_v42 = vmul.f32 %v1820_v43, %v573_v25 }
 0x99f   :  { %v719_v48 = vpop.permute.xlu0 %718 }
 0x9a0   :  { %v721_v49 = vmul.f32 %v1820_v43, %v719_v48 }
 0x9a2   :  { %723 = vrot.lane.b32.xlu1 %v721_v49, %s1883_s3 }
 0xa14   :  { %v724_v50 = vpop.permute.xlu1 %723 }
 0xa15   :  { %v726_v51 = vadd.f32 %v724_v50, %v716_v42 }
 0xa17   :  { %1821 = vtanh.f32 %v726_v51 }
 0xa21   :  { %v1822_v52 = vpop.eup %1821 }
 0xa22   :  { %729 = vrot.lane.b32.xlu0 %v1822_v52, %s1882_s21 }
 0xa94   :  { %v730_v53 = vpop.permute.xlu0 %729 }
 0xa95   :  { %v2068_v54 = vmul.f32 %v1820_v43, %v730_v53 }
 0xa97   :  { %v814_v55 = vpack.c.bf16 %v2068_v54, %v2068_v54 }
 0xa99   :  { %816 = vrot.lane.b32.xlu1 %v814_v55, %s1883_s3 }
 0xb0b   :  { %v817_v56 = vpop.permute.xlu1 %816 }
 0xb0c   :  { %1661 = vmatmul.mubr.msk.bf16.vlgmr.msra.gmra.mrb[20].mxu0 %vm192_vm2, %v817_v56 }
 0xb0d   :  { %1676 = vmatpush3.bf16.msra.mxu0 %v1949_v7  ;;  %1679 = vmatprep.mubr.msk.bf16.mxu0 %vm1880_vm1, %v1879_v3 }
 0xb0e   :  { %1677 = vmatprep.subr.bf16.mxu0 %v1879_v3 }
 0xb11   :  { %1678 = vmatpush3.bf16.msra.mxu0 %v1962_v11 }
 0xb12   :  { %1694 = vmatprep.subr.bf16.mxu0 %v1879_v3 }
 0xbdf   :  { %v855_v58 = vpop.f32.mrb[20].mxu0 }
 0xbe0   :  { %v861_v59 = vadd.f32 %v855_v58, %v161_v57  ;;  %v1662_v60 = vpop.f32.mrb[21].mxu0 }
 0xbe1   :  { %v858_v61 = vpop.f32.mrb[22].mxu0 }
 0xbe2   :  { %1823 = vtanh.f32 %v861_v59  ;;  %v1663_v62 = vpop.f32.mrb[23].mxu0  ;;  %v1479_v0 = vmul.f32 -1.442695, %v861_v59 }
 0xbe4   :  { %1825 = vpow2.f32 %v1479_v0 }
 0xbec   :  { %v1824_v63 = vpop.eup %1823 }
 0xbed   :  { %871 = vrot.lane.b32.xlu0 %v1824_v63, %s1882_s21  ;;  %v176_v63 = vadd.f32 %v2020_v46, %v1977_v13 }
 0xbee   :  { %v1826_v1 = vpop.eup %1825 }
 0xbef   :  { %v865_v2 = vadd.f32 1.0, %v1826_v1 }
 0xbf1   :  { %1827 = vrcp.f32 %v865_v2 }
 0xbfb   :  { %v1828_v5 = vpop.eup %1827 }
 0xbfc   :  { %v869_v45 = vmul.f32 %v1828_v5, %v726_v51 }
 0xc5f   :  { %v872_v6 = vpop.permute.xlu0 %871 }
 0xc60   :  { %v874_v8 = vmul.f32 %v1828_v5, %v872_v6 }
 0xc62   :  { %876 = vrot.lane.b32.xlu1 %v874_v8, %s1883_s3 }
 0xcd4   :  { %v877_v9 = vpop.permute.xlu1 %876 }
 0xcd5   :  { %v879_v10 = vadd.f32 %v877_v9, %v869_v45  ;;  %v185_v45 = vld [vmem:[%s2242_s4] sm:$0xff]  ;;  %v186_v9 = vld [vmem:[%s2242_s4 + $0x8] sm:$0xff] }
 0xcd6   :  { %v2130_v13 = vpack.c.bf16 %v186_v9, %v185_v45 }
 0xcd7   :  { %1829 = vtanh.f32 %v879_v10 }
 0xce1   :  { %v1830_v12 = vpop.eup %1829 }
 0xce2   :  { %882 = vrot.lane.b32.xlu0 %v1830_v12, %s1882_s21 }
 0xd54   :  { %v883_v14 = vpop.permute.xlu0 %882 }
 0xd55   :  { %v2085_v15 = vmul.f32 %v1828_v5, %v883_v14 }
 0xd57   :  { %v967_v16 = vpack.c.bf16 %v2085_v15, %v2085_v15 }
 0xd59   :  { %969 = vrot.lane.b32.xlu1 %v967_v16, %s1883_s3  ;;  %v187_v16 = vld [vmem:[%s2242_s4 + $0x10] sm:$0xff] }
 0xdcb   :  { %v970_v17 = vpop.permute.xlu1 %969 }
 0xdcc   :  { %1680 = vmatmul.mubr.msk.bf16.vlgmr.msra.gmra.mrb[24].mxu0 %vm192_vm2, %v970_v17  ;;  %v188_v17 = vld [vmem:[%s2242_s4 + $0x18] sm:$0xff] }
 0xdcd   :  { %1695 = vmatpush3.bf16.msra.mxu0 %v1949_v7  ;;  %1698 = vmatprep.mubr.msk.bf16.mxu0 %vm1880_vm1, %v1879_v3 }
 0xdce   :  { %1696 = vmatprep.subr.bf16.mxu0 %v1879_v3 }
 0xdd1   :  { %1697 = vmatpush3.bf16.msra.mxu0 %v1962_v11 }
 0xdd2   :  { %1713 = vmatprep.subr.bf16.mxu0 %v1879_v3 }
 0xe9f   :  { %v1008_v19 = vpop.f32.mrb[24].mxu0 }
 0xea0   :  { %v1014_v20 = vadd.f32 %v1008_v19, %v166_v18  ;;  %v1681_v21 = vpop.f32.mrb[25].mxu0  ;;  %v2140_v18 = vpack.c.bf16 %v188_v17, %v187_v16 }
 0xea1   :  { %v1011_v22 = vpop.f32.mrb[26].mxu0 }
 0xea2   :  { %1831 = vtanh.f32 %v1014_v20  ;;  %v1682_v23 = vpop.f32.mrb[27].mxu0  ;;  %v1482_v25 = vmul.f32 -1.442695, %v1014_v20 }
 0xea4   :  { %1833 = vpow2.f32 %v1482_v25 }
 0xeac   :  { %v1832_v24 = vpop.eup %1831 }
 0xead   :  { %1024 = vrot.lane.b32.xlu0 %v1832_v24, %s1882_s21 }
 0xeae   :  { %v1834_v26 = vpop.eup %1833 }
 0xeaf   :  { %v1018_v27 = vadd.f32 1.0, %v1834_v26 }
 0xeb1   :  { %1835 = vrcp.f32 %v1018_v27 }
 0xebb   :  { %v1836_v29 = vpop.eup %1835 }
 0xebc   :  { %v1022_v44 = vmul.f32 %v1836_v29, %v879_v10  ;;  %v1884_v10 = vmov 0.0|0.0  }
 0xebd   :  { %1736 = vmatprep.subr.bf16.mxu1 %v1884_v10 }
 0xebe   :  { %1738 = vmatpush3.bf16.msra.mxu1 %v2130_v13 }
 0xebf   :  { %1739 = vmatprep.subr.bf16.mxu1 %v1884_v10 }
 0xec2   :  { %1741 = vmatpush3.bf16.msra.mxu1 %v2140_v18 }
 0xec3   :  { %1742 = vmatprep.subr.bf16.mxu1 %v1884_v10 }
 0xf1f   :  { %v1025_v30 = vpop.permute.xlu0 %1024 }
 0xf20   :  { %v1027_v31 = vmul.f32 %v1836_v29, %v1025_v30 }
 0xf22   :  { %1029 = vrot.lane.b32.xlu1 %v1027_v31, %s1883_s3  ;;  %v1466_v31 = vld [vmem:[%s2243_s5] ss:$0 sm:$0xff] }
 0xf94   :  { %v1030_v32 = vpop.permute.xlu1 %1029 }
 0xf95   :  { %v1032_v33 = vadd.f32 %v1030_v32, %v1022_v44 }
 0xf97   :  { %1837 = vtanh.f32 %v1032_v33 }
 0xfa1   :  { %v1838_v34 = vpop.eup %1837 }
 0xfa2   :  { %1035 = vrot.lane.b32.xlu0 %v1838_v34, %s1882_s21  ;;  %v1468_v34 = vld [vmem:[%s2244_s6] ss:$0 sm:$0xff] }
0x1014   :  { %v1036_v35 = vpop.permute.xlu0 %1035 }
0x1015   :  { %v2102_v36 = vmul.f32 %v1836_v29, %v1036_v35 }
0x1017   :  { %v1120_v37 = vpack.c.bf16 %v2102_v36, %v2102_v36 }
0x1019   :  { %1122 = vrot.lane.b32.xlu1 %v1120_v37, %s1883_s3 }
0x108b   :  { %v1123_v38 = vpop.permute.xlu1 %1122 }
0x108c   :  { %1699 = vmatmul.mubr.msk.bf16.vlgmr.msra.gmra.mrb[28].mxu0 %vm192_vm2, %v1123_v38 }
0x108d   :  { %1714 = vmatpush3.bf16.msra.mxu0 %v1949_v7  ;;  %1717 = vmatprep.mubr.msk.bf16.mxu0 %vm1880_vm1, %v1879_v3 }
0x108e   :  { %1715 = vmatprep.subr.bf16.mxu0 %v1879_v3 }
0x1091   :  { %1716 = vmatpush3.bf16.msra.mxu0 %v1962_v11 }
0x115f   :  { %v1161_v41 = vpop.f32.mrb[28].mxu0 }
0x1160   :  { %v1167_v43 = vadd.f32 %v1161_v41, %v171_v39  ;;  %v1700_v48 = vpop.f32.mrb[29].mxu0 }
0x1161   :  { %v1164_v49 = vpop.f32.mrb[30].mxu0 }
0x1162   :  { %1839 = vtanh.f32 %v1167_v43  ;;  %v1701_v42 = vpop.f32.mrb[31].mxu0  ;;  %v1485_v7 = vmul.f32 -1.442695, %v1167_v43 }
0x1164   :  { %1841 = vpow2.f32 %v1485_v7 }
0x116c   :  { %v1840_v50 = vpop.eup %1839 }
0x116d   :  { %1177 = vrot.lane.b32.xlu0 %v1840_v50, %s1882_s21 }
0x116e   :  { %v1842_v51 = vpop.eup %1841 }
0x116f   :  { %v1171_v52 = vadd.f32 1.0, %v1842_v51 }
0x1171   :  { %1843 = vrcp.f32 %v1171_v52 }
0x117b   :  { %v1844_v53 = vpop.eup %1843 }
0x117c   :  { %v1175_v47 = vmul.f32 %v1844_v53, %v1032_v33 }
0x11df   :  { %v1178_v55 = vpop.permute.xlu0 %1177 }
0x11e0   :  { %v1180_v11 = vmul.f32 %v1844_v53, %v1178_v55 }
0x11e2   :  { %1182 = vrot.lane.b32.xlu1 %v1180_v11, %s1883_s3 }
0x1254   :  { %v1183_v56 = vpop.permute.xlu1 %1182 }
0x1255   :  { %v1185_v57 = vadd.f32 %v1183_v56, %v1175_v47 }
0x1257   :  { %1845 = vtanh.f32 %v1185_v57 }
0x1261   :  { %v1846_v58 = vpop.eup %1845 }
0x1262   :  { %1188 = vrot.lane.b32.xlu0 %v1846_v58, %s1882_s21 }
0x12d4   :  { %v1189_v59 = vpop.permute.xlu0 %1188 }
0x12d5   :  { %v1191_v60 = vmul.f32 %v1844_v53, %v1189_v59 }
0x12d7   :  { %v1273_v61 = vpack.c.bf16 %v1191_v60, %v1191_v60 }
0x12d9   :  { %1275 = vrot.lane.b32.xlu1 %v1273_v61, %s1883_s3 }
0x134b   :  { %v1276_v62 = vpop.permute.xlu1 %1275 }
0x134c   :  { %1718 = vmatmul.mubr.msk.bf16.vlgmr.msra.gmra.mrb[32].mxu0 %vm192_vm2, %v1276_v62 }
0x141f   :  { %v1314_v0 = vpop.f32.mrb[32].mxu0 }
0x1420   :  { %v1320_v1 = vadd.f32 %v1314_v0, %v176_v63  ;;  %v1719_v2 = vpop.f32.mrb[33].mxu0 }
0x1421   :  { %v1317_v5 = vpop.f32.mrb[34].mxu0 }
0x1422   :  { %1847 = vtanh.f32 %v1320_v1  ;;  %v1720_v6 = vpop.f32.mrb[35].mxu0  ;;  %v1488_v46 = vmul.f32 -1.442695, %v1320_v1 }
0x1424   :  { %1849 = vpow2.f32 %v1488_v46 }
0x142c   :  { %v1848_v8 = vpop.eup %1847 }
0x142d   :  { %1330 = vrot.lane.b32.xlu0 %v1848_v8, %s1882_s21 }
0x142e   :  { %v1850_v12 = vpop.eup %1849 }
0x142f   :  { %v1324_v14 = vadd.f32 1.0, %v1850_v12 }
0x1431   :  { %1851 = vrcp.f32 %v1324_v14 }
0x143b   :  { %v1852_v19 = vpop.eup %1851 }
0x143c   :  { %v1328_v22 = vmul.f32 %v1852_v19, %v1185_v57 }
0x149f   :  { %v1331_v20 = vpop.permute.xlu0 %1330 }
0x14a0   :  { %v1333_v21 = vmul.f32 %v1852_v19, %v1331_v20 }
0x14a2   :  { %1335 = vrot.lane.b32.xlu1 %v1333_v21, %s1883_s3 }
0x14a6   :  { %268 = vrot.lane.b32.xlu1 %v2009_v40, %s1883_s3 }
0x14aa   :  { %581 = vrot.lane.b32.xlu1 %v2051_v28, %s1883_s3 }
0x14ae   :  { %887 = vrot.lane.b32.xlu1 %v2085_v15, %s1883_s3 }
0x14b2   :  { %1193 = vrot.lane.b32.xlu1 %v1191_v60, %s1883_s3 }
0x1514   :  { %v1336_v23 = vpop.permute.xlu1 %1335 }
0x1515   :  { %v1338_v24 = vadd.f32 %v1336_v23, %v1328_v22 }
0x1517   :  { %1853 = vtanh.f32 %v1338_v24 }
0x1518   :  { %v269_v25 = vpop.permute.xlu1 %268 }
0x1519   :  { %1597 = vmatmul.mubr.msk.f32.vlgmr.msra.gmra.mrb[4].mxu1 %vm192_vm2, %v269_v25 }
0x151a   :  { %1744 = vmatpush3.bf16.msra.mxu1 %v2130_v13  ;;  %1615 = vmatprep.mubr.msk.f32.mxu1 %vm1880_vm1, %v1879_v3 }
0x151b   :  { %1745 = vmatprep.subr.bf16.mxu1 %v1884_v10 }
0x151e   :  { %1747 = vmatpush3.bf16.msra.mxu1 %v2140_v18 }
0x151f   :  { %1748 = vmatprep.subr.bf16.mxu1 %v1884_v10 }
0x1521   :  { %v1854_v40 = vpop.eup %1853 }
0x1522   :  { %1341 = vrot.lane.b32.xlu0 %v1854_v40, %s1882_s21 }
0x1526   :  { %428 = vrot.lane.b32.xlu0 %v2035_v4, %s1883_s3  ;;  %v582_v4 = vpop.permute.xlu1 %581 }
0x152a   :  { %734 = vrot.lane.b32.xlu0 %v2068_v54, %s1883_s3  ;;  %v888_v27 = vpop.permute.xlu1 %887 }
0x152e   :  { %1040 = vrot.lane.b32.xlu0 %v2102_v36, %s1883_s3  ;;  %v1194_v30 = vpop.permute.xlu1 %1193 }
0x1594   :  { %v1342_v28 = vpop.permute.xlu0 %1341 }
0x1595   :  { %v1344_v15 = vmul.f32 %v1852_v19, %v1342_v28  ;;  %v353_v28 = vstv %s2245_s7  ;;  %s1448_s7 = sshll.u32 %s1885_s20, 4  ;;  %s1449_s7 = int_to_ptr.vmem [resolvable:$true] %s1448_s7 }
0x1596   :  { %s1855_s21 = scalar_lea.vmem %s1449_s7, 128  ;;  %p1860_p1 = scmp.lt.s32.totalorder %s1449_s7, %s1449_s7 }
0x1597   :  { %1346 = vrot.lane.b32.xlu0 %v1344_v15, %s1883_s3  ;;  %p1856_p0 = scmp.ne.s32.totalorder %s1449_s7, %s1855_s21  ;;  %p1861_p2 = scmp.lt.s32.totalorder %s1855_s21, %s1855_s21 }
0x1598   :  { %v429_v26 = vpop.permute.xlu0 %428 }
0x1599   :  { %1616 = vmatmul.mubr.msk.f32.vlgmr.msra.gmra.mrb[6].mxu1 %vm192_vm2, %v429_v26  ;;  %p1862_p3 = por %p1861_p2, %p1860_p1 }
0x159a   :  { %1750 = vmatpush3.bf16.msra.mxu1 %v2130_v13  ;;  %1634 = vmatprep.mubr.msk.f32.mxu1 %vm1880_vm1, %v1879_v3 }
0x159b   :  { %1751 = vmatprep.subr.bf16.mxu1 %v1884_v10  ;;  %p1863_p4 = pnand %p1862_p3, %p1856_p0 }
0x159c   :  { %v735_v54 = vpop.permute.xlu0 %734 }
0x159e   :  { %1753 = vmatpush3.bf16.msra.mxu1 %v2140_v18 }
0x159f   :  { %1754 = vmatprep.subr.bf16.mxu1 %v1884_v10 }
0x15a0   :  { %v1041_v29 = vpop.permute.xlu0 %1040 }
0x15a1   :  { %1635 = vmatmul.mubr.msk.f32.vlgmr.msra.gmra.mrb[8].mxu1 %vm192_vm2, %v582_v4 }
0x15a2   :  { %1756 = vmatpush3.bf16.msra.mxu1 %v2130_v13  ;;  %1653 = vmatprep.mubr.msk.f32.mxu1 %vm1880_vm1, %v1879_v3 }
0x15a3   :  { %1757 = vmatprep.subr.bf16.mxu1 %v1884_v10 }
0x15a6   :  { %1759 = vmatpush3.bf16.msra.mxu1 %v2140_v18 }
0x15a7   :  { %1760 = vmatprep.subr.bf16.mxu1 %v1884_v10 }
0x15a9   :  { %1654 = vmatmul.mubr.msk.f32.vlgmr.msra.gmra.mrb[10].mxu1 %vm192_vm2, %v735_v54 }
0x15aa   :  { %1762 = vmatpush3.bf16.msra.mxu1 %v2130_v13  ;;  %1672 = vmatprep.mubr.msk.f32.mxu1 %vm1880_vm1, %v1879_v3 }
0x15ab   :  { %1763 = vmatprep.subr.bf16.mxu1 %v1884_v10 }
0x15ae   :  { %1765 = vmatpush3.bf16.msra.mxu1 %v2140_v18 }
0x15af   :  { %1766 = vmatprep.subr.bf16.mxu1 %v1884_v10 }
0x15b1   :  { %1673 = vmatmul.mubr.msk.f32.vlgmr.msra.gmra.mrb[12].mxu1 %vm192_vm2, %v888_v27 }
0x15b2   :  { %1768 = vmatpush3.bf16.msra.mxu1 %v2130_v13  ;;  %1691 = vmatprep.mubr.msk.f32.mxu1 %vm1880_vm1, %v1879_v3 }
0x15b3   :  { %1769 = vmatprep.subr.bf16.mxu1 %v1884_v10 }
0x15b6   :  { %1771 = vmatpush3.bf16.msra.mxu1 %v2140_v18 }
0x15b7   :  { %1772 = vmatprep.subr.bf16.mxu1 %v1884_v10 }
0x15b9   :  { %1692 = vmatmul.mubr.msk.f32.vlgmr.msra.gmra.mrb[14].mxu1 %vm192_vm2, %v1041_v29 }
0x15ba   :  { %1774 = vmatpush3.bf16.msra.mxu1 %v2130_v13  ;;  %1710 = vmatprep.mubr.msk.f32.mxu1 %vm1880_vm1, %v1879_v3 }
0x15bb   :  { %1775 = vmatprep.subr.bf16.mxu1 %v1884_v10 }
0x15be   :  { %1777 = vmatpush3.bf16.msra.mxu1 %v2140_v18 }
0x15bf   :  { %1778 = vmatprep.subr.bf16.mxu1 %v1884_v10 }
0x15c1   :  { %1711 = vmatmul.mubr.msk.f32.vlgmr.msra.gmra.mrb[16].mxu1 %vm192_vm2, %v1194_v30 }
0x15c2   :  { %1780 = vmatpush3.bf16.msra.mxu1 %v2130_v13  ;;  %1729 = vmatprep.mubr.msk.f32.mxu1 %vm1880_vm1, %v1879_v3 }
0x15c3   :  { %1781 = vmatprep.subr.bf16.mxu1 %v1884_v10 }
0x15c6   :  { %1783 = vmatpush3.bf16.msra.mxu1 %v2140_v18 }
0x15ec   :  { %v338_v44 = vpop.f32.mrb[4].mxu1 }
0x15ed   :  { %v339_v32 = vadd.f32 %v1466_v31, %v338_v44  ;;  %v1598_v33 = vpop.f32.mrb[5].mxu1 }
0x15ef   :  { %v342_v35 = vmax.f32 %v339_v32, 0.0 }
0x15f1   :  { %v349_v36 = vmul.f32 %v1468_v34, %v342_v35 }
0x15f3   :  { %v350_v37 = vsel %vm192_vm2, %v349_v36, 0.0 }
0x15f4   :  { %351 = vadd.xlane.f32.xlu1 %v350_v37 }
0x1609   :  { %v1347_v3 = vpop.permute.xlu0 %1346 }
0x160a   :  { %1730 = vmatmul.mubr.msk.f32.vlgmr.msra.gmra.mrb[18].mxu1 %vm192_vm2, %v1347_v3 }
0x166c   :  { %v498_v38 = vpop.f32.mrb[6].mxu1 }
0x166d   :  { %v499_v39 = vadd.f32 %v1466_v31, %v498_v38  ;;  %v1617_v41 = vpop.f32.mrb[7].mxu1 }
0x166f   :  { %v502_v43 = vmax.f32 %v499_v39, 0.0 }
0x1671   :  { %v503_v48 = vmul.f32 %v1468_v34, %v502_v43 }
0x1673   :  { %v504_v49 = vsel %vm192_vm2, %v503_v48, 0.0 }
0x1674   :  { %v651_v42 = vpop.f32.mrb[8].mxu1  ;;  %505 = vadd.xlane.f32.xlu0 %v504_v49 }
0x1675   :  { %v652_v50 = vadd.f32 %v1466_v31, %v651_v42  ;;  %v1636_v7 = vpop.f32.mrb[9].mxu1 }
0x1677   :  { %v655_v51 = vmax.f32 %v652_v50, 0.0 }
0x1679   :  { %v656_v52 = vmul.f32 %v1468_v34, %v655_v51 }
0x167b   :  { %v657_v53 = vsel %vm192_vm2, %v656_v52, 0.0 }
0x167c   :  { %658 = vadd.xlane.f32.xlu0 %v657_v53  ;;  %v804_v55 = vpop.f32.mrb[10].mxu1 }
0x167d   :  { %v805_v11 = vadd.f32 %v1466_v31, %v804_v55  ;;  %v1655_v47 = vpop.f32.mrb[11].mxu1 }
0x167f   :  { %v808_v56 = vmax.f32 %v805_v11, 0.0 }
0x1681   :  { %v809_v57 = vmul.f32 %v1468_v34, %v808_v56  ;;  %v352_v23 = vpop.xlane.xlu1 %351 }
0x1682   :  { %v354_v54 = vadd.f32 %v353_v28, %v352_v23 }
0x1683   :  { %v810_v58 = vsel %vm192_vm2, %v809_v57, 0.0 }
0x1684   :  { %811 = vadd.xlane.f32.xlu1 %v810_v58  ;;  %v957_v59 = vpop.f32.mrb[12].mxu1 }
0x1685   :  { %v958_v60 = vadd.f32 %v1466_v31, %v957_v59  ;;  %v1674_v61 = vpop.f32.mrb[13].mxu1 }
0x1687   :  { %v961_v62 = vmax.f32 %v958_v60, 0.0 }
0x1689   :  { %v962_v63 = vmul.f32 %v1468_v34, %v961_v62 }
0x168b   :  { %v963_v0 = vsel %vm192_vm2, %v962_v63, 0.0 }
0x168c   :  { %964 = vadd.xlane.f32.xlu0 %v963_v0  ;;  %v1110_v1 = vpop.f32.mrb[14].mxu1 }
0x168d   :  { %v1111_v2 = vadd.f32 %v1466_v31, %v1110_v1  ;;  %v1693_v5 = vpop.f32.mrb[15].mxu1 }
0x168f   :  { %v1114_v6 = vmax.f32 %v1111_v2, 0.0 }
0x1691   :  { %v1115_v8 = vmul.f32 %v1468_v34, %v1114_v6 }
0x1693   :  { %v1116_v45 = vsel %vm192_vm2, %v1115_v8, 0.0 }
0x1694   :  { %1117 = vadd.xlane.f32.xlu1 %v1116_v45  ;;  %v1263_v9 = vpop.f32.mrb[16].mxu1 }
0x1695   :  { %v1264_v10 = vadd.f32 %v1466_v31, %v1263_v9  ;;  %v1712_v13 = vpop.f32.mrb[17].mxu1 }
0x1697   :  { %v1267_v46 = vmax.f32 %v1264_v10, 0.0 }
0x1699   :  { %v1268_v12 = vmul.f32 %v1468_v34, %v1267_v46 }
0x169b   :  { %v1269_v14 = vsel %vm192_vm2, %v1268_v12, 0.0 }
0x169c   :  { %1270 = vadd.xlane.f32.xlu0 %v1269_v14 }
0x16dd   :  { %v1416_v16 = vpop.f32.mrb[18].mxu1 }
0x16de   :  { %v1417_v17 = vadd.f32 %v1466_v31, %v1416_v16  ;;  %v1731_v18 = vpop.f32.mrb[19].mxu1 }
0x16e0   :  { %v1420_v19 = vmax.f32 %v1417_v17, 0.0 }
0x16e2   :  { %v1421_v20 = vmul.f32 %v1468_v34, %v1420_v19 }
0x16e4   :  { %v1422_v21 = vsel %vm192_vm2, %v1421_v20, 0.0 }
0x16e5   :  { %1423 = vadd.xlane.f32.xlu1 %v1422_v21 }
0x1701   :  { %v506_v22 = vpop.xlane.xlu0 %505 }
0x1702   :  { %v507_v15 = vadd.f32 %v506_v22, %v353_v28 }
0x1704   :  { %v1427_v31 = vsel %vm1426_vm3, %v354_v54, %v507_v15 }
0x1709   :  { %v659_v24 = vpop.xlane.xlu0 %658 }
0x170a   :  { %v660_v26 = vadd.f32 %v659_v24, %v353_v28 }
0x170c   :  { %v1429_v32 = vsel %vm1428_vm4, %v1427_v31, %v660_v26 }
0x1711   :  { %v812_v25 = vpop.xlane.xlu1 %811 }
0x1712   :  { %v813_v27 = vadd.f32 %v812_v25, %v353_v28 }
0x1714   :  { %v1431_v34 = vsel %vm1430_vm5, %v1429_v32, %v813_v27 }
0x1719   :  { %v965_v40 = vpop.xlane.xlu0 %964 }
0x171a   :  { %v966_v30 = vadd.f32 %v965_v40, %v353_v28 }
0x171c   :  { %v1433_v35 = vsel %vm1432_vm6, %v1431_v34, %v966_v30 }
0x1721   :  { %v1118_v4 = vpop.xlane.xlu1 %1117 }
0x1722   :  { %v1119_v44 = vadd.f32 %v1118_v4, %v353_v28 }
0x1724   :  { %v1435_v37 = vsel %vm1434_vm7, %v1433_v35, %v1119_v44 }
0x1729   :  { %v1271_v29 = vpop.xlane.xlu0 %1270 }
0x172a   :  { %v1272_v33 = vadd.f32 %v1271_v29, %v353_v28 }
0x172c   :  { %v1437_v38 = vsel %vm1436_vm8, %v1435_v37, %v1272_v33 }
0x1772   :  { %v1424_v36 = vpop.xlane.xlu1 %1423 }
0x1773   :  { %v1425_v3 = vadd.f32 %v1424_v36, %v353_v28 }
0x1775   :  { %v1439_v39 = vsel %vm1438_vm9, %v1437_v38, %v1425_v3 }
0x1776   :  { %1441 = vst.msk [vmem:[#allocation3] sm:$0xff] %vm1440_vm10, %v1439_v39 }
0x1777   :  { %1866 = shalt.err (!%p1863_p4)
}
0x1778   :  { %s1867_s23 = scalar_lea.hbm %s2246_s8, 128 }
0x1779   :  { %p1868_p5 = scmp.ne.s32.totalorder %s2246_s8, %s1867_s23  ;;  %p1871_p6 = scmp.lt.u32.totalorder %s1867_s23, %s2246_s8 }
0x177b   :  { %p1873_p7 = pnand %p1871_p6, %p1868_p5 }
0x177d   :  { %1876 = shalt.err (!%p1873_p7)
}
0x177e   :  { %1451 = dma.vmem_to_hbm [thread:$0]  %s1449_s7, 128, %s2246_s8, [#allocation4]  }
0x177f   :  { %1877 = dma.done.wait [#allocation4], 128  }
0x1780   :  { %1878 = vsyncadd [#allocation4], 4294967168 }
0x1781   :  { %1455 = vsyncpa [#allocation4], 1 }

</bundles_post_ra>
